<compile_context>
chip_gen: v7x
topology: tpu7x:2x2x1
jax: 0.10.0
libtpu: 0.0.40
codegen_flags: <defaults>
</compile_context>

<pallas_src>
import functools

import jax
import jax.numpy as jnp
from jax import lax
from jax.experimental import pallas as pl
from jax.experimental.pallas import tpu as pltpu


def _round_up(x, m):
    return (x + m - 1) // m * m


def _tpu_info():
    """Returns (vmem_capacity_bytes, multi_tensorcore). Conservative defaults."""
    vmem_cap = 64 * 1024 * 1024          # safe default (v7x-sized)
    multi_tc = False
    try:
        vmem_cap = int(pltpu.get_tpu_info().vmem_capacity_bytes)
    except Exception:
        pass
    try:
        kind = jax.devices()[0].device_kind.lower()
        multi_tc = ("v7" in kind) or ("7x" in kind)
    except Exception:
        pass
    return vmem_cap, multi_tc


def _plan_tiles(B, D, C, in_bytes, w_bytes, batch_major, tile_budget, multi_tc):
    """Choose (B_pad, tm, D_pad, tk). tm divides B_pad; tk == D means no K-tiling."""
    b128 = _round_up(max(B, 1), 128)
    n128 = b128 // 128
    tm_cap_blocks = (512 if multi_tc else 1024) // 128
    max_blocks = min(n128, tm_cap_blocks)
    if multi_tc and n128 >= 2:
        # Keep >= 2 batch grid steps so both v7x TensorCores get work.
        max_blocks = min(max_blocks, max(1, n128 // 2))
    tm_cands = [128 * d for d in range(max_blocks, 0, -1) if n128 % d == 0]

    lanes = lambda n: _round_up(n, 128)   # last dim padded to 128 lanes in VMEM
    subl = lambda n: _round_up(n, 16)     # second-last dim padded (16: covers bf16)

    def fits(tm, tk_eff):
        x_t = 2 * tm * lanes(tk_eff) * in_bytes          # double-buffered x tile
        w_t = 2 * subl(C) * lanes(tk_eff) * w_bytes      # Pallas double-buffers W too
        out_elems = tm * lanes(C) if batch_major else subl(C) * tm
        o_t = 2 * out_elems * 4 + out_elems * 4          # 2 f32 out buffers + f32 acc
        bias = 2 * max(subl(C) * 128, 8 * lanes(C)) * 4
        return x_t + w_t + o_t + bias <= tile_budget

    # Preferred: no K-tiling (tk == full D, no padding of D).
    for tm in tm_cands:
        if fits(tm, D):
            return b128, tm, D, D
    # Escape hatch for large D: K-tile the reduction, pad D to a multiple of tk.
    for tk in (1024, 512, 256, 128):
        for tm in tm_cands:
            if fits(tm, tk):
                return b128, tm, _round_up(D, tk), tk
    return b128, 128, _round_up(D, 128), 128


def _classifier_kernel_cmajor(w_ref, x_ref, b_ref, o_ref, acc_ref, *, approx):
    # w_ref: (C, tk), x_ref: (tm, tk), b_ref: (C, 1), o_ref: (C, tm), acc_ref: (C, tm) f32
    # Output tile is (C, tm): batch sits on the 128-lane axis -> lane-dense stores
    # even when num_classes is tiny.
    k = pl.program_id(1)

    @pl.when(k == 0)
    def _():
        acc_ref[...] = jnp.broadcast_to(b_ref[...], acc_ref.shape)  # bias folded into init

    acc_ref[...] += lax.dot_general(
        w_ref[...], x_ref[...],
        dimension_numbers=(((1,), (1,)), ((), ())),   # contract D: (C,tk)x(tm,tk)->(C,tm)
        preferred_element_type=jnp.float32,
    )

    @pl.when(k == pl.num_programs(1) - 1)
    def _():
        z = acc_ref[...]
        o_ref[...] = pl.reciprocal(1.0 + jnp.exp(-z), approx=approx).astype(o_ref.dtype)


def _classifier_kernel_bmajor(x_ref, w_ref, b_ref, o_ref, acc_ref, *, approx):
    # x_ref: (tm, tk), w_ref: (C, tk), b_ref: (1, C), o_ref: (tm, C), acc_ref: (tm, C) f32
    # Used when C >= 128: (tm, C) is already lane-dense, no output transpose needed.
    k = pl.program_id(1)

    @pl.when(k == 0)
    def _():
        acc_ref[...] = jnp.broadcast_to(b_ref[...], acc_ref.shape)

    acc_ref[...] += lax.dot_general(
        x_ref[...], w_ref[...],
        dimension_numbers=(((1,), (1,)), ((), ())),   # contract D: (tm,tk)x(C,tk)->(tm,C)
        preferred_element_type=jnp.float32,
    )

    @pl.when(k == pl.num_programs(1) - 1)
    def _():
        z = acc_ref[...]
        o_ref[...] = pl.reciprocal(1.0 + jnp.exp(-z), approx=approx).astype(o_ref.dtype)


def classifier_forward(x, w, b, *, use_bf16=True):
    """x: (B, D); w: (C, D); b: (C,) -> sigmoid(x @ w.T + b), shape (B, C), float32."""
    B, D = x.shape
    C = w.shape[0]

    vmem_cap, multi_tc = _tpu_info()
    tile_budget = min(vmem_cap // 2, 64 * 1024 * 1024)        # 32 MiB on v7x, 64 MiB on v5e/v6e
    vmem_limit = int(min(vmem_cap * 3 // 4, 100 * 1024 * 1024))

    in_dtype = jnp.bfloat16 if use_bf16 else x.dtype
    w_dtype = jnp.bfloat16 if use_bf16 else w.dtype
    in_bytes = jnp.dtype(in_dtype).itemsize
    w_bytes = jnp.dtype(w_dtype).itemsize

    batch_major = C >= 128   # big heads: write (tm, C) directly, skip output transpose

    B_pad, tm, D_pad, tk = _plan_tiles(
        B, D, C, in_bytes, w_bytes, batch_major, tile_budget, multi_tc)

    x_p = x
    if (B_pad, D_pad) != (B, D):
        x_p = jnp.pad(x, ((0, B_pad - B), (0, D_pad - D)))
    w_p = w if D_pad == D else jnp.pad(w, ((0, 0), (0, D_pad - D)))
    x_p = x_p.astype(in_dtype)
    w_p = w_p.astype(w_dtype)

    nb, nk = B_pad // tm, D_pad // tk
    grid = (nb, nk)
    approx = bool(use_bf16)   # approx reciprocal only where bf16 already dominates error

    cost = pl.CostEstimate(
        flops=2 * B_pad * D_pad * C,
        transcendentals=B_pad * C,
        bytes_accessed=(in_bytes * B_pad * D_pad + w_bytes * C * D_pad
                        + 4 * (C * B_pad + C)),
    )
    cparams = pltpu.CompilerParams(
        dimension_semantics=("parallel", "arbitrary"),
        vmem_limit_bytes=vmem_limit,
    )

    if batch_major:
        b_row = b.reshape(1, C).astype(jnp.float32)
        out = pl.pallas_call(
            functools.partial(_classifier_kernel_bmajor, approx=approx),
            out_shape=jax.ShapeDtypeStruct((B_pad, C), jnp.float32),
            grid_spec=pltpu.PrefetchScalarGridSpec(
                num_scalar_prefetch=0,
                grid=grid,
                in_specs=[
                    pl.BlockSpec((tm, tk), lambda i, k: (i, k)),   # batch/K-tiled x
                    pl.BlockSpec((C, tk), lambda i, k: (0, k)),    # K-tiled weight
                    pl.BlockSpec((1, C), lambda i, k: (0, 0)),     # bias row, reused
                ],
                out_specs=pl.BlockSpec((tm, C), lambda i, k: (i, 0)),
                scratch_shapes=[pltpu.VMEM((tm, C), jnp.float32)],
            ),
            compiler_params=cparams,
            cost_estimate=cost,
        )(x_p, w_p, b_row)
        return out[:B]

    b_col = b.reshape(C, 1).astype(jnp.float32)
    out_ct = pl.pallas_call(
        functools.partial(_classifier_kernel_cmajor, approx=approx),
        out_shape=jax.ShapeDtypeStruct((C, B_pad), jnp.float32),
        grid_spec=pltpu.PrefetchScalarGridSpec(
            num_scalar_prefetch=0,
            grid=grid,
            in_specs=[
                pl.BlockSpec((C, tk), lambda i, k: (0, k)),        # K-tiled weight
                pl.BlockSpec((tm, tk), lambda i, k: (i, k)),       # batch/K-tiled x
                pl.BlockSpec((C, 1), lambda i, k: (0, 0)),         # bias column, reused
            ],
            out_specs=pl.BlockSpec((C, tm), lambda i, k: (0, i)),  # lane-dense out
            scratch_shapes=[pltpu.VMEM((C, tm), jnp.float32)],
        ),
        compiler_params=cparams,
        cost_estimate=cost,
    )(w_p, x_p, b_col)
    # Drop padded rows; tiny (C, B) -> (B, C) transpose matches torch.cat(dim=1).
    return out_ct[:, :B].T


def reference_forward(x, w, b):
    # Pure-JAX reference, mathematically identical to the per-class
    # Linear(input_dim, 1) + Sigmoid loop concatenated along dim 1.
    logits = jnp.dot(x, w.T, precision=lax.Precision.HIGHEST) + b
    return jax.nn.sigmoid(logits)


if __name__ == "__main__":
    root = jax.random.PRNGKey(0)
    k_small, k_large = jax.random.split(root, 2)

    def make_case(key, batch, input_dim, num_classes):
        kx, kw, kb = jax.random.split(key, 3)
        # PyTorch nn.Linear-style init: uniform(-1/sqrt(in), 1/sqrt(in)).
        bound = 1.0 / jnp.sqrt(jnp.float32(input_dim))
        w = jax.random.uniform(kw, (num_classes, input_dim), jnp.float32, -bound, bound)
        b = jax.random.uniform(kb, (num_classes,), jnp.float32, -bound, bound)
        x = jax.random.normal(kx, (batch, input_dim), jnp.float32)
        return x, w, b

    # Small-C case (module-sized example): class-major (C, tm) kernel path.
    x, w, b = make_case(k_small, batch=16, input_dim=32, num_classes=4)
    ref = reference_forward(x, w, b)

    out_f32 = jax.block_until_ready(classifier_forward(x, w, b, use_bf16=False))
    assert out_f32.shape == (16, 4)
    assert jnp.allclose(out_f32, ref, atol=1e-4, rtol=1e-4), "f32 path mismatch"

    out_bf16 = jax.block_until_ready(classifier_forward(x, w, b))   # default bf16 inputs
    assert out_bf16.shape == (16, 4)
    assert jnp.allclose(out_bf16, ref, atol=1e-2, rtol=1e-2), "bf16 path mismatch"

    # Large-C case: exercises the batch-major (tm, C) orientation (no output transpose).
    x2, w2, b2 = make_case(k_large, batch=64, input_dim=32, num_classes=256)
    ref2 = reference_forward(x2, w2, b2)
    out2 = jax.block_until_ready(classifier_forward(x2, w2, b2))
    assert out2.shape == (64, 256)
    assert jnp.allclose(out2, ref2, atol=1e-2, rtol=1e-2), "large-C path mismatch"

    print("KERNEL_OK")
</pallas_src>

<mosaic_0001>
module attributes {stable_mosaic.version = 11 : i64} {
  func.func @_classifier_kernel_cmajor(%arg0: i32, %arg1: i32, %arg2: memref<4x32xf32, #tpu.memory_space<vmem>>, %arg3: memref<128x32xf32, #tpu.memory_space<vmem>>, %arg4: memref<4x1xf32, #tpu.memory_space<vmem>>, %arg5: memref<4x128xf32, #tpu.memory_space<vmem>>, %arg6: memref<4x128xf32, #tpu.memory_space<vmem>>) attributes {dimension_semantics = [#tpu.dimension_semantics<parallel>, #tpu.dimension_semantics<arbitrary>], iteration_bounds = array<i64: 1, 1>, scalar_prefetch = 0 : i64, scratch_operands = 1 : i64, tpu.core_type = #tpu.core_type<tc>, window_params = [{transform_indices = @transform_0, window_bounds = array<i64: 4, 32>}, {transform_indices = @transform_1, window_bounds = array<i64: 128, 32>}, {pipeline_mode = #tpu.pipeline_mode<synchronous>, transform_indices = @transform_2, window_bounds = array<i64: 4, 1>}, {transform_indices = @transform_3, window_bounds = array<i64: 4, 128>}]} {
    %c0_i32 = arith.constant 0 : i32
    %0 = arith.cmpi eq, %arg1, %c0_i32 : i32
    %1 = arith.extui %0 : i1 to i32
    %c0_i32_0 = arith.constant 0 : i32
    %2 = arith.cmpi ne, %1, %c0_i32_0 : i32
    scf.if %2 {
      %c0_10 = arith.constant 0 : index
      %c0_11 = arith.constant 0 : index
      %12 = vector.load %arg4[%c0_10, %c0_11] : memref<4x1xf32, #tpu.memory_space<vmem>>, vector<4x1xf32>
      %13 = vector.shape_cast %12 : vector<4x1xf32> to vector<4x1xf32>
      %14 = vector.broadcast %13 : vector<4x1xf32> to vector<4x128xf32>
      %c0_12 = arith.constant 0 : index
      %c0_13 = arith.constant 0 : index
      %15 = vector.load %arg6[%c0_12, %c0_13] : memref<4x128xf32, #tpu.memory_space<vmem>>, vector<4x128xf32>
      tpu.vector_store %arg6[%c0_12, %c0_13], %14 {strides = array<i32>} : memref<4x128xf32, #tpu.memory_space<vmem>>, vector<4x128xf32>,
    } else {
    }
    %c0 = arith.constant 0 : index
    %c0_1 = arith.constant 0 : index
    %3 = vector.load %arg6[%c0, %c0_1] : memref<4x128xf32, #tpu.memory_space<vmem>>, vector<4x128xf32>
    %c0_2 = arith.constant 0 : index
    %c0_3 = arith.constant 0 : index
    %4 = vector.load %arg2[%c0_2, %c0_3] : memref<4x32xf32, #tpu.memory_space<vmem>>, vector<4x32xf32>
    %c0_4 = arith.constant 0 : index
    %c0_5 = arith.constant 0 : index
    %5 = vector.load %arg3[%c0_4, %c0_5] : memref<128x32xf32, #tpu.memory_space<vmem>>, vector<128x32xf32>
    %cst = arith.constant dense<0.000000e+00> : vector<4x128xf32>
    %6 = tpu.matmul %4, %5, %cst {dimension_numbers = #tpu.dot_dimension_numbers<[1], [1], [0], [0], [0, 0, 1, 0], [], []>} : vector<4x32xf32>, vector<128x32xf32>, vector<4x128xf32> -> vector<4x128xf32>
    %7 = arith.addf %3, %6 : vector<4x128xf32>
    %c0_6 = arith.constant 0 : index
    %c0_7 = arith.constant 0 : index
    %8 = vector.load %arg6[%c0_6, %c0_7] : memref<4x128xf32, #tpu.memory_space<vmem>>, vector<4x128xf32>
    tpu.vector_store %arg6[%c0_6, %c0_7], %7 {strides = array<i32>} : memref<4x128xf32, #tpu.memory_space<vmem>>, vector<4x128xf32>,
    %c0_i32_8 = arith.constant 0 : i32
    %9 = arith.cmpi eq, %arg1, %c0_i32_8 : i32
    %10 = arith.extui %9 : i1 to i32
    %c0_i32_9 = arith.constant 0 : i32
    %11 = arith.cmpi ne, %10, %c0_i32_9 : i32
    scf.if %11 {
      %c0_10 = arith.constant 0 : index
      %c0_11 = arith.constant 0 : index
      %12 = vector.load %arg6[%c0_10, %c0_11] : memref<4x128xf32, #tpu.memory_space<vmem>>, vector<4x128xf32>
      %cst_12 = arith.constant 0.000000e+00 : f32
      %13 = vector.broadcast %cst_12 : f32 to vector<4x128xf32>
      %14 = arith.subf %13, %12 : vector<4x128xf32>
      %15 = math.exp %14 : vector<4x128xf32>
      %cst_13 = arith.constant 1.000000e+00 : f32
      %16 = vector.broadcast %cst_13 : f32 to vector<4x128xf32>
      %17 = arith.addf %16, %15 : vector<4x128xf32>
      %18 = tpu.reciprocal %17 : vector<4x128xf32> -> vector<4x128xf32>
      %c0_14 = arith.constant 0 : index
      %c0_15 = arith.constant 0 : index
      %19 = vector.load %arg5[%c0_14, %c0_15] : memref<4x128xf32, #tpu.memory_space<vmem>>, vector<4x128xf32>
      tpu.vector_store %arg5[%c0_14, %c0_15], %18 {strides = array<i32>} : memref<4x128xf32, #tpu.memory_space<vmem>>, vector<4x128xf32>,
    } else {
    }
    return
  }
  func.func @transform_0(%arg0: i32, %arg1: i32) -> (i32, i32) {
    %c0_i32 = arith.constant 0 : i32
    %c0_i32_0 = arith.constant 0 : i32
    return %c0_i32, %arg1 : i32, i32
  }
  func.func @transform_1(%arg0: i32, %arg1: i32) -> (i32, i32) {
    %c0_i32 = arith.constant 0 : i32
    return %arg0, %arg1 : i32, i32
  }
  func.func @transform_2(%arg0: i32, %arg1: i32) -> (i32, i32) {
    %c0_i32 = arith.constant 0 : i32
    %c0_i32_0 = arith.constant 0 : i32
    %c0_i32_1 = arith.constant 0 : i32
    return %c0_i32, %c0_i32_0 : i32, i32
  }
  func.func @transform_3(%arg0: i32, %arg1: i32) -> (i32, i32) {
    %c0_i32 = arith.constant 0 : i32
    %c0_i32_0 = arith.constant 0 : i32
    return %c0_i32, %arg0 : i32, i32
  }
}

</mosaic_0001>

<bundles_post_ra>
// kernel: tpu_custom_call.1
= control target key start
LH: loop header
LB: loop body
LE: loop exit
PB: predicated region body
PF: predicated region fallthrough
CT: control target
= control target key end

     0   :  { %vm44_vm0 = vcmask 261120   ;;  %v327_v2 = vmov 0.0|0.0   ;;  %vm328_vm2 = vmmov 0   ;;  %v329_v5 = vmov 0.0   ;;  %s441_s0 = inlined_call_operand.vmem [shape: f32[4,32], index: 0, kind: input, shape index: {}]   ;;  %s442_s1 = inlined_call_operand.vmem [shape: f32[128,32], index: 1, kind: input, shape index: {}]   ;;  %s443_s2 = inlined_call_operand.vmem [shape: f32[4,1], index: 2, kind: input, shape index: {}]   ;;  %s444_s3 = inlined_call_operand.hbm [shape: f32[4,128], index: 3, kind: output, shape index: {}]  }
   0x1   :  { %v28_v0 = vld [vmem:[%s442_s1] sm:$0xff]  ;;  %v29_v1 = vld [vmem:[%s442_s1 + $0x8] sm:$0xff]  ;;  %261 = vmatprep.subr.bf16.mxu0 %v327_v2  ;;  %vm360_vm1 = vmpackc.low %vm44_vm0, %vm44_vm0  ;;  %258 = vmatprep.mubr.msk.f32.mxu0 %vm328_vm2, %v329_v5  ;;  %v330_v6 = vmov 0  }
   0x2   :  { %v262_v3 = vpack.c.bf16 %v29_v1, %v28_v0  ;;  %298 = vset.pattern.permute.xlu0 %v330_v6  ;;  %v30_v7 = vld [vmem:[%s442_s1 + $0x10] sm:$0xff]  ;;  %v31_v8 = vld [vmem:[%s442_s1 + $0x18] sm:$0xff]  ;;  %v19_v9 = vld [vmem:[%s443_s2] sm:$0xf] }
   0x4   :  { %264 = vmatpush3.bf16.xpose.msk.msra.mxu0 %vm360_vm1, %v262_v3 }
   0x5   :  { %265 = vmatprep.subr.bf16.mxu0 %v327_v2 }
   0x6   :  { %8 = vsyncpa [#allocation4], 0  ;;  %v266_v10 = vpack.c.bf16 %v31_v8, %v30_v7  ;;  %22 = vperm.xlu0 %298, %v19_v9   ;;  %v32_v11 = vld [vmem:[%s442_s1 + $0x20] sm:$0xff]  ;;  %v33_v12 = vld [vmem:[%s442_s1 + $0x28] sm:$0xff] }
   0x7   :  { %v270_v13 = vpack.c.bf16 %v33_v12, %v32_v11  ;;  %v34_v14 = vld [vmem:[%s442_s1 + $0x30] sm:$0xff]  ;;  %v35_v15 = vld [vmem:[%s442_s1 + $0x38] sm:$0xff]  ;;  %v36_v17 = vld [vmem:[%s442_s1 + $0x40] sm:$0xff] }
   0x8   :  { %v274_v16 = vpack.c.bf16 %v35_v15, %v34_v14  ;;  %v37_v18 = vld [vmem:[%s442_s1 + $0x48] sm:$0xff]  ;;  %v38_v20 = vld [vmem:[%s442_s1 + $0x50] sm:$0xff]  ;;  %v39_v21 = vld [vmem:[%s442_s1 + $0x58] sm:$0xff] }
   0x9   :  { %v278_v19 = vpack.c.bf16 %v37_v18, %v36_v17  ;;  %v282_v22 = vpack.c.bf16 %v39_v21, %v38_v20  ;;  %v40_v23 = vld [vmem:[%s442_s1 + $0x60] sm:$0xff]  ;;  %v41_v24 = vld [vmem:[%s442_s1 + $0x68] sm:$0xff]  ;;  %v42_v26 = vld [vmem:[%s442_s1 + $0x70] sm:$0xff] }
   0xa   :  { %v286_v25 = vpack.c.bf16 %v41_v24, %v40_v23  ;;  %v43_v27 = vld [vmem:[%s442_s1 + $0x78] sm:$0xff]  ;;  %v27_v29 = vld [vmem:[%s441_s0] sm:$0xf]  ;;  %s331_s1 = smov [#allocation3]  }
   0xb   :  { %v290_v28 = vpack.c.bf16 %v43_v27, %v42_v26  ;;  %s184_s20 = sshll.u32 %s331_s1, 4  ;;  %s185_s20 = int_to_ptr.vmem [resolvable:$true] %s184_s20 }
   0xc   :  { %268 = vmatpush3.bf16.xpose.msk.msra.mxu0 %vm360_vm1, %v266_v10  ;;  %s303_s0 = scalar_lea.vmem %s185_s20, 64  ;;  %p308_p1 = scmp.lt.s32.totalorder %s185_s20, %s185_s20 }
   0xd   :  { %269 = vmatprep.subr.bf16.mxu0 %v327_v2  ;;  %p304_p0 = scmp.ne.s32.totalorder %s185_s20, %s303_s0  ;;  %p309_p2 = scmp.lt.s32.totalorder %s303_s0, %s303_s0 }
   0xf   :  { %p310_p3 = por %p309_p2, %p308_p1 }
  0x11   :  { %p311_p4 = pnand %p310_p3, %p304_p0 }
  0x14   :  { %272 = vmatpush3.bf16.xpose.msk.msra.mxu0 %vm360_vm1, %v270_v13 }
  0x15   :  { %273 = vmatprep.subr.bf16.mxu0 %v327_v2 }
  0x1c   :  { %276 = vmatpush3.bf16.xpose.msk.msra.mxu0 %vm360_vm1, %v274_v16 }
  0x1d   :  { %277 = vmatprep.subr.bf16.mxu0 %v327_v2 }
  0x24   :  { %280 = vmatpush3.bf16.xpose.msk.msra.mxu0 %vm360_vm1, %v278_v19 }
  0x25   :  { %281 = vmatprep.subr.bf16.mxu0 %v327_v2 }
  0x2c   :  { %284 = vmatpush3.bf16.xpose.msk.msra.mxu0 %vm360_vm1, %v282_v22 }
  0x2d   :  { %285 = vmatprep.subr.bf16.mxu0 %v327_v2 }
  0x34   :  { %288 = vmatpush3.bf16.xpose.msk.msra.mxu0 %vm360_vm1, %v286_v25 }
  0x35   :  { %289 = vmatprep.subr.bf16.mxu0 %v327_v2 }
  0x3c   :  { %292 = vmatpush3.bf16.xpose.msk.msra.mxu0 %vm360_vm1, %v290_v28 }
  0x43   :  { %259 = vmatmul.mubr.msk.f32.vlgmr.msra.gmra.mrb[0].mxu0 %vm44_vm0, %v27_v29 }
  0x85   :  { %v23_v30 = vpop.permute.xlu0 %22 }
  0x86   :  { %25 = vst [vmem:[#allocation2] sm:$0xf] %v23_v30 }
  0x8d   :  { %v26_v31 = vld [vmem:[#allocation2] sm:$0xf] }
 0x116   :  { %v162_v32 = vpop.f32.mrb[0].mxu0 }
 0x117   :  { %v166_v33 = vadd.f32 %v162_v32, %v26_v31  ;;  %v260_v34 = vpop.f32.mrb[1].mxu0 }
 0x119   :  { %167 = vst [vmem:[#allocation2] sm:$0xf] %v166_v33 }
 0x120   :  { %v171_v35 = vld [vmem:[#allocation2] sm:$0xf] }
 0x121   :  { %v172_v36 = vsub.f32 0.0, %v171_v35 }
 0x123   :  { %v173_v37 = vmul.f32 1.442695, %v172_v36 }
 0x125   :  { %299 = vpow2.f32 %v173_v37 }
 0x12f   :  { %v300_v38 = vpop.eup %299 }
 0x130   :  { %v175_v39 = vadd.f32 1.0, %v300_v38 }
 0x132   :  { %301 = vrcp.f32 %v175_v39 }
 0x13c   :  { %v302_v40 = vpop.eup %301 }
 0x13d   :  { %177 = vst [vmem:[#allocation3] sm:$0xf] %v302_v40 }
 0x13e   :  { %314 = shalt.err (!%p311_p4)
}
 0x13f   :  { %s315_s23 = scalar_lea.hbm %s444_s3, 64 }
 0x140   :  { %p316_p5 = scmp.ne.s32.totalorder %s444_s3, %s315_s23  ;;  %p319_p6 = scmp.lt.u32.totalorder %s315_s23, %s444_s3 }
 0x142   :  { %p321_p7 = pnand %p319_p6, %p316_p5 }
 0x144   :  { %324 = shalt.err (!%p321_p7)
}
 0x145   :  { %187 = dma.vmem_to_hbm [thread:$0]  %s185_s20, 64, %s444_s3, [#allocation4]  }
 0x146   :  { %325 = dma.done.wait [#allocation4], 64  }
 0x147   :  { %326 = vsyncadd [#allocation4], 4294967232 }
 0x148   :  { %191 = vsyncpa [#allocation4], 1 }

</bundles_post_ra>
